<compile_context>
chip_gen: v5e
topology: v5e:2x2
jax: 0.10.0
libtpu: 0.0.40
codegen_flags: <defaults>
</compile_context>

<pallas_src>
import jax
import jax.numpy as jnp
from jax.experimental import pallas as pl
from jax.experimental.pallas import tpu as pltpu


def _round_up(x: int, m: int) -> int:
    return ((x + m - 1) // m) * m


def _pick_div_tile(dim: int, max_tile: int, align: int) -> int:
    """Largest tile t <= max_tile with t % align == 0 and dim % t == 0.

    Falls back to a single full-extent block (t = dim) when no aligned divisor
    exists -- full-extent blocks satisfy the (8, 128) constraint by definition.
    """
    if dim <= max_tile:
        return dim
    t = (max_tile // align) * align
    while t >= align:
        if dim % t == 0:
            return t
        t -= align
    return dim


# ----------------------------- Pallas kernels ----------------------------- #
def _linear_kernel_k1(x_ref, w_ref, b_ref, o_ref):
    # Single K block: x_ref [tm, D] bf16, w_ref [D, tn] bf16, b_ref [1, tn] f32.
    # No accumulator scratch: one MXU dot (f32 accumulate) + bias, direct store.
    acc = jnp.dot(x_ref[...], w_ref[...], preferred_element_type=jnp.float32)
    o_ref[...] = (acc + b_ref[...]).astype(o_ref.dtype)


def _linear_kernel_multi(x_ref, w_ref, b_ref, o_ref, acc_ref):
    # x_ref [tm, tk] bf16, w_ref [tk, tn] bf16, b_ref [1, tn] f32,
    # acc_ref [tm, tn] f32 scratch resident across the K axis.
    k = pl.program_id(2)

    @pl.when(k == 0)
    def _():
        acc_ref[...] = jnp.zeros_like(acc_ref)

    acc_ref[...] += jnp.dot(
        x_ref[...], w_ref[...], preferred_element_type=jnp.float32
    )

    @pl.when(k == pl.num_programs(2) - 1)
    def _():
        o_ref[...] = (acc_ref[...] + b_ref[...]).astype(o_ref.dtype)


# ------------------------------ host wrapper ------------------------------ #
def linear_pallas(x, w_padded, b2d, *, tn, tk, n_out=None, out_dtype=None,
                  max_tm=512):
    """y = x @ w + b.

    `w_padded` is the pre-padded (D, Cp) bf16 weight, `b2d` the (1, Cp) f32
    bias (both padded once at construction time).  tk divides D exactly so x
    is never padded along D.  Returns the (B, n_out) result.
    """
    B, D = x.shape
    D2, Cp = w_padded.shape
    assert D == D2 and b2d.shape == (1, Cp)
    assert D % tk == 0 and Cp % tn == 0
    out_dtype = out_dtype or x.dtype

    # bf16 operands for the MXU (cast once here; accumulate in f32 in-kernel).
    if x.dtype != jnp.bfloat16:
        x = x.astype(jnp.bfloat16)

    # M tile: full-extent block for small batches (no pad), else pad to 512s.
    if B <= max_tm:
        tm, Bp = B, B
    else:
        tm = max_tm
        Bp = _round_up(B, tm)
    x_p = x if Bp == B else jnp.pad(x, ((0, Bp - B), (0, 0)))

    nk = D // tk
    cost = pl.CostEstimate(
        flops=2 * Bp * D * Cp,
        transcendentals=0,
        bytes_accessed=(
            x_p.size * x_p.dtype.itemsize
            + w_padded.size * w_padded.dtype.itemsize
            + b2d.size * b2d.dtype.itemsize
            + Bp * Cp * jnp.dtype(out_dtype).itemsize
        ),
    )

    if nk == 1:
        # Shallow-K head: 2-D grid, no accumulator scratch.
        out_padded = pl.pallas_call(
            _linear_kernel_k1,
            out_shape=jax.ShapeDtypeStruct((Bp, Cp), out_dtype),
            grid_spec=pltpu.PrefetchScalarGridSpec(
                num_scalar_prefetch=0,
                grid=(Bp // tm, Cp // tn),
                in_specs=[
                    pl.BlockSpec((tm, D), lambda i, j: (i, 0)),
                    pl.BlockSpec((D, tn), lambda i, j: (0, j)),
                    pl.BlockSpec((1, tn), lambda i, j: (0, j)),
                ],
                out_specs=pl.BlockSpec((tm, tn), lambda i, j: (i, j)),
            ),
            compiler_params=pltpu.CompilerParams(
                dimension_semantics=("parallel", "parallel"),
            ),
            cost_estimate=cost,
        )(x_p, w_padded, b2d)
    else:
        out_padded = pl.pallas_call(
            _linear_kernel_multi,
            out_shape=jax.ShapeDtypeStruct((Bp, Cp), out_dtype),
            grid_spec=pltpu.PrefetchScalarGridSpec(
                num_scalar_prefetch=0,
                grid=(Bp // tm, Cp // tn, nk),
                in_specs=[
                    pl.BlockSpec((tm, tk), lambda i, j, k: (i, k)),
                    pl.BlockSpec((tk, tn), lambda i, j, k: (k, j)),
                    # bias ignores M/K axes: one fetch per N tile.
                    pl.BlockSpec((1, tn), lambda i, j, k: (0, j)),
                ],
                out_specs=pl.BlockSpec((tm, tn), lambda i, j, k: (i, j)),
                scratch_shapes=[pltpu.VMEM((tm, tn), jnp.float32)],
            ),
            compiler_params=pltpu.CompilerParams(
                dimension_semantics=("parallel", "parallel", "arbitrary"),
            ),
            cost_estimate=cost,
        )(x_p, w_padded, b2d)

    n_out = Cp if n_out is None else n_out
    if Bp != B or n_out != Cp:
        out_padded = out_padded[:B, :n_out]
    return out_padded


# ------------------------------- Classifier -------------------------------- #
class ClassifierPallas:
    """JAX/Pallas equivalent of the PyTorch Classifier module."""

    def __init__(self, model_fn, input_dim, num_classes, key,
                 weight_dtype=jnp.bfloat16, max_tn=512, max_tk=2048,
                 tiny_fast_path=False):
        # TODO(synk): the `model` backbone is an opaque constructor argument in
        # the PyTorch module; identity is used unless a backbone fn is given.
        self.model_fn = model_fn if model_fn is not None else (lambda x: x)
        self.input_dim = int(input_dim)
        self.num_classes = int(num_classes)
        self.tiny_fast_path = tiny_fast_path

        # nn.Linear default init: U(-1/sqrt(input_dim), 1/sqrt(input_dim)).
        kw, kb = jax.random.split(key)
        bound = 1.0 / float(input_dim) ** 0.5
        w = jax.random.uniform(
            kw, (input_dim, num_classes), jnp.float32, -bound, bound)
        b = jax.random.uniform(kb, (num_classes,), jnp.float32, -bound, bound)

        # Static tile choices (depend only on D / C) and one-time padding of
        # the parameters: weight pre-transposed to (D, Cp) bf16, bias (1, Cp).
        self.tk = _pick_div_tile(self.input_dim, max_tk, 128)
        self.tn = _pick_div_tile(_round_up(self.num_classes, 128), max_tn, 128)
        Cp = _round_up(self.num_classes, self.tn)
        self.w = jnp.pad(w, ((0, 0), (0, Cp - num_classes))).astype(weight_dtype)
        self.b2d = jnp.pad(b, (0, Cp - num_classes)).reshape(1, Cp)

        # Unpadded copies kept for the tiny fast path / reference checks.
        self.w_unpadded = w.astype(weight_dtype)
        self.b = b

    def __call__(self, x):
        feats = self.model_fn(x)  # backbone (identity by default)
        lead = feats.shape[:-1]
        assert feats.shape[-1] == self.input_dim
        feats2d = feats.reshape(-1, self.input_dim)

        if self.tiny_fast_path and feats2d.shape[0] * self.input_dim <= 8 * 128:
            # For trivially small problems, pallas_call launch overhead
            # dominates; plain XLA dot is faster.  (OFF in the demo so the
            # Pallas kernel is exercised.)
            y = (feats2d.astype(jnp.bfloat16).astype(jnp.float32)
                 @ self.w_unpadded.astype(jnp.float32) + self.b)
            return y.astype(feats.dtype).reshape(*lead, self.num_classes)

        out = linear_pallas(
            feats2d, self.w, self.b2d,
            tn=self.tn, tk=self.tk,
            n_out=self.num_classes, out_dtype=feats.dtype,
        )
        return out.reshape(*lead, self.num_classes)


# ---------------------------------- main ----------------------------------- #
if __name__ == "__main__":
    key = jax.random.PRNGKey(0)
    k_in, k_params = jax.random.split(key)

    batch, input_dim, num_classes = 8, 32, 10
    x = jax.random.normal(k_in, (batch, input_dim), jnp.float32)

    clf = ClassifierPallas(
        model_fn=None, input_dim=input_dim, num_classes=num_classes, key=k_params
    )

    y = jax.block_until_ready(clf(x))

    # Reference with the same bf16 operand rounding as the MXU path.
    x_bf = x.astype(jnp.bfloat16).astype(jnp.float32)
    w_f = clf.w_unpadded.astype(jnp.float32)
    y_ref = x_bf @ w_f + clf.b

    assert y.shape == (batch, num_classes)
    y32 = y.astype(jnp.float32)
    err = float(jnp.max(jnp.abs(y32 - y_ref)))
    assert jnp.allclose(y32, y_ref, atol=2e-3, rtol=2e-3), err

    print("KERNEL_OK")
</pallas_src>

<mosaic_0001>
module attributes {stable_mosaic.version = 11 : i64} {
  func.func @_linear_kernel_k1(%arg0: i32, %arg1: i32, %arg2: memref<8x32xbf16, #tpu.memory_space<vmem>>, %arg3: memref<32x128xbf16, #tpu.memory_space<vmem>>, %arg4: memref<1x128xf32, #tpu.memory_space<vmem>>, %arg5: memref<8x128xf32, #tpu.memory_space<vmem>>) attributes {dimension_semantics = [#tpu.dimension_semantics<parallel>, #tpu.dimension_semantics<parallel>], iteration_bounds = array<i64: 1, 1>, scalar_prefetch = 0 : i64, scratch_operands = 0 : i64, tpu.core_type = #tpu.core_type<tc>, window_params = [{transform_indices = @transform_0, window_bounds = array<i64: 8, 32>}, {transform_indices = @transform_1, window_bounds = array<i64: 32, 128>}, {transform_indices = @transform_2, window_bounds = array<i64: 1, 128>}, {transform_indices = @transform_3, window_bounds = array<i64: 8, 128>}]} {
    %c0 = arith.constant 0 : index
    %c0_0 = arith.constant 0 : index
    %0 = vector.load %arg2[%c0, %c0_0] : memref<8x32xbf16, #tpu.memory_space<vmem>>, vector<8x32xbf16>
    %c0_1 = arith.constant 0 : index
    %c0_2 = arith.constant 0 : index
    %1 = vector.load %arg3[%c0_1, %c0_2] : memref<32x128xbf16, #tpu.memory_space<vmem>>, vector<32x128xbf16>
    %cst = arith.constant dense<0.000000e+00> : vector<8x128xf32>
    %2 = tpu.matmul %0, %1, %cst {dimension_numbers = #tpu.dot_dimension_numbers<[1], [0], [0], [1], [0, 0, 1, 1], [], []>} : vector<8x32xbf16>, vector<32x128xbf16>, vector<8x128xf32> -> vector<8x128xf32>
    %c0_3 = arith.constant 0 : index
    %c0_4 = arith.constant 0 : index
    %3 = vector.load %arg4[%c0_3, %c0_4] : memref<1x128xf32, #tpu.memory_space<vmem>>, vector<1x128xf32>
    %4 = vector.broadcast %3 : vector<1x128xf32> to vector<8x128xf32>
    %5 = arith.addf %2, %4 : vector<8x128xf32>
    %c0_5 = arith.constant 0 : index
    %c0_6 = arith.constant 0 : index
    %6 = vector.load %arg5[%c0_5, %c0_6] : memref<8x128xf32, #tpu.memory_space<vmem>>, vector<8x128xf32>
    tpu.vector_store %arg5[%c0_5, %c0_6], %5 {strides = array<i32>} : memref<8x128xf32, #tpu.memory_space<vmem>>, vector<8x128xf32>,
    return
  }
  func.func @transform_0(%arg0: i32, %arg1: i32) -> (i32, i32) {
    %c0_i32 = arith.constant 0 : i32
    %c0_i32_0 = arith.constant 0 : i32
    return %arg0, %c0_i32 : i32, i32
  }
  func.func @transform_1(%arg0: i32, %arg1: i32) -> (i32, i32) {
    %c0_i32 = arith.constant 0 : i32
    %c0_i32_0 = arith.constant 0 : i32
    return %c0_i32, %arg1 : i32, i32
  }
  func.func @transform_2(%arg0: i32, %arg1: i32) -> (i32, i32) {
    %c0_i32 = arith.constant 0 : i32
    %c0_i32_0 = arith.constant 0 : i32
    return %c0_i32, %arg1 : i32, i32
  }
  func.func @transform_3(%arg0: i32, %arg1: i32) -> (i32, i32) {
    %c0_i32 = arith.constant 0 : i32
    return %arg0, %arg1 : i32, i32
  }
}

</mosaic_0001>

<bundles_post_ra>
// kernel: tpu_custom_call.1
= control target key start
LH: loop header
LB: loop body
LE: loop exit
PB: predicated region body
PF: predicated region fallthrough
CT: control target
= control target key end

     0   :  { %8 = vsyncpa [#allocation3], 0  ;;  %s235_s0 = inlined_call_operand.hbm [shape: bf16[8,32], index: 0, kind: input, shape index: {}]   ;;  %s236_s1 = inlined_call_operand.hbm [shape: bf16[32,128], index: 1, kind: input, shape index: {}]   ;;  %s237_s2 = inlined_call_operand.vmem [shape: f32[1,128], index: 2, kind: input, shape index: {}]   ;;  %s238_s3 = inlined_call_operand.hbm [shape: f32[8,128], index: 3, kind: output, shape index: {}]  }
   0x1   :  { %9 = vsyncpa [#allocation6], 0 }
   0x2   :  { %10 = vsyncpa [#allocation4], 0  ;;  %s16_s14 = sshll.u32 %s235_s0, 4  ;;  %s198_s15 = smov [#allocation2]   ;;  %s17_s14 = int_to_ptr.hbm [resolvable:$true] %s16_s14 }
   0x3   :  { %s18_s16 = sshll.u32 %s198_s15, 4  ;;  %s26_s19 = sshll.u32 %s236_s1, 4  ;;  %s19_s16 = int_to_ptr.vmem [resolvable:$true] %s18_s16  ;;  %s27_s19 = int_to_ptr.hbm [resolvable:$true] %s26_s19 }
   0x4   :  { %21 = dma.hbm_to_vmem [thread:$0]  %s17_s14, 64, %s19_s16, [#allocation3]  }
   0x5   :  { %s199_s20 = smov [#allocation5]   ;;  %s200_s22 = smov 64  }
   0x6   :  { %s28_s21 = sshll.u32 %s199_s20, 4  ;;  %s201_s23 = smov 4   ;;  %s29_s21 = int_to_ptr.vmem [resolvable:$true] %s28_s21 }
   0x7   :  { %34 = dma.hbm_to_vmem [thread:$0]  %s27_s19, 256, %s29_s21, [#allocation6], %s200_s22, %s200_s22, %s201_s23  }
   0x8   :  { %192 = dma.done.wait [#allocation3], 64  }
   0x9   :  { %193 = vsyncadd [#allocation3], 4294967232 }
   0xa   :  { %194 = dma.done.wait [#allocation6], 256  }
   0xb   :  { %195 = vsyncadd [#allocation6], 4294967040  ;;  %v113_v0 = vld [vmem:[#allocation5 + $0x8] sm:$0xff]  ;;  %v112_v1 = vld [vmem:[#allocation5] sm:$0xff]  ;;  %vm67_vm0 = vcmask 261120   ;;  %s202_s24 = smov [#allocation7]  }
   0xc   :  { %77 = vmatpush.bf16.msra.mxu0 %v113_v0  ;;  %v46_v2 = vld [vmem:[#allocation2] sm:$0xf]  ;;  %s90_s25 = sshll.u32 %s202_s24, 4  ;;  %s92_s28 = sshll.u32 %s238_s3, 4  ;;  %s91_s25 = int_to_ptr.vmem [resolvable:$true] %s90_s25  ;;  %s93_s28 = int_to_ptr.hbm [resolvable:$true] %s92_s28 }
   0xd   :  { %v119_v3 = vld [vmem:[%s237_s2] ss:$0 sm:$0xff] }
  0x10   :  { %78 = vmatpush.bf16.msra.mxu0 %v112_v1 }
  0x13   :  { %111 = vmatmul.msk.bf16.vlgmr.msra.gmra.mxu0 %vm67_vm0, %v46_v2 }
  0x90   :  { %v80_v4 = vpop.f32.mrf.mxu0 }
  0x91   :  { %v81_v5 = vadd.f32 %v119_v3, %v80_v4 }
  0x93   :  { %84 = vst [vmem:[#allocation7] sm:$0xff] %v81_v5 }
  0x94   :  { %95 = dma.vmem_to_hbm [thread:$0]  %s91_s25, 128, %s93_s28, [#allocation4]  }
  0x98   :  { %v82_v6 = vpop.f32.mrf.mxu0 }
  0x99   :  { %196 = dma.done.wait [#allocation4], 128  }
  0x9a   :  { %197 = vsyncadd [#allocation4], 4294967168 }
  0x9b   :  { %100 = vsyncpa [#allocation3], 1 }
  0x9c   :  { %101 = vsyncpa [#allocation6], 1 }
  0x9d   :  { %102 = vsyncpa [#allocation4], 1 }

</bundles_post_ra>
